<compile_context>
chip_gen: v5e
topology: v5e:2x2
jax: 0.10.0
libtpu: 0.0.40
codegen_flags: <defaults>
</compile_context>

<pallas_src>
import jax
import jax.numpy as jnp
from jax import lax
from jax.experimental import pallas as pl
from jax.experimental.pallas import tpu as pltpu

NEG_SLOPE = 0.2          # LeakyReLU negative slope of the VQ-VAE encoder
_MAX_TILE_COLS = 8192    # cap on the folded-length tile (multiple of 128)


def _leaky(x):
    return jnp.where(x > 0, x, NEG_SLOPE * x)


def _vmem_limit_bytes():
    """48 MiB on v7x-class chips (64 MiB physical VMEM), 96 MiB on v5e/v6e."""
    cap = 64 * 1024 * 1024
    try:
        cap = int(getattr(pltpu.get_tpu_info(), "vmem_capacity_bytes", cap))
    except Exception:
        pass
    return 48 * 1024 * 1024 if cap <= 64 * 1024 * 1024 else 96 * 1024 * 1024


def _tile_budget_cols(C, H, D, K, vmem_limit_bytes):
    """Max folded-L columns per tile from a rough f32 per-column footprint."""
    per_col = 4 * (12 * C + 3 * H + 6 * D + 5 * K + 16)
    return max(128, (vmem_limit_bytes // 2) // per_col)


def _plan_tiles(Lf0, budget_cols, tl=None):
    """Pick (TL, JT): TL a multiple of 128, JT * TL >= Lf0."""
    if tl is not None:
        TL = max(128, (int(tl) // 128) * 128)
        return TL, -(-Lf0 // TL)
    TL = max(128, (min(budget_cols, _MAX_TILE_COLS) // 128) * 128)
    JT = -(-Lf0 // TL)
    if JT == 1:
        if Lf0 > 256:
            JT = 2                 # keep >=2 parallel steps for 2-TC chips (v7x)
        TL = ((-(-Lf0 // JT) + 127) // 128) * 128
    return TL, JT


# ---------------------------------------------------------------------------
# Fused kernel: res1 -> res2 -> pre_vq_conv1 (k=1) -> VQ nearest neighbour.
# Layout: channels on sublanes, folded (batch*length) on the 128-lane axis.
# ---------------------------------------------------------------------------
def _fused_vqvae_kernel(x_ref, halo_ref, vm_ref,
                        w1a_ref, b1a_ref, w2a_ref, b2a_ref,
                        w1b_ref, b1b_ref, w2b_ref, b2b_ref,
                        wp_ref, bp_ref, e_ref, c2_ref, o_ref):
    x = x_ref[...]                                   # (C, TL) f32, folded tile
    TL = x.shape[1]
    mdt = w1a_ref.dtype                              # MXU operand dtype (pre-cast)

    # Haloed window [-2, TL+2): 2+2 edge columns come from neighbouring tiles
    # (zeros at the folded ends), so the two stacked k=3 convs need no cross-
    # tile communication.
    hal = halo_ref[...]                              # (C, 4)
    xh = jnp.concatenate([hal[:, 0:2], x, hal[:, 2:4]], axis=1)       # (C, TL+4)

    # ---- residual block 1, computed on window [-1, TL+1) ---------------------
    h = _leaky(xh)
    # k=3 conv as ONE fused MXU matmul: stack the three shifted static slices
    # along channels -> (3C, TL+2), contract against the flattened (H, 3C) weight.
    h_cat = jnp.concatenate([h[:, 0:TL + 2], h[:, 1:TL + 3], h[:, 2:TL + 4]],
                            axis=0)                                   # (3C, TL+2)
    a1 = jnp.dot(w1a_ref[...], h_cat.astype(mdt),
                 preferred_element_type=jnp.float32) + b1a_ref[...]   # (H, TL+2)
    a1 = _leaky(a1)
    r1 = jnp.dot(w2a_ref[...], a1.astype(mdt),
                 preferred_element_type=jnp.float32) + b2a_ref[...]   # (C, TL+2)
    # Skip connection, then zero every column outside its sample's [0, L) range
    # (separator / tail padding / out-of-range halo columns).  This reproduces
    # PyTorch's zero padding for res2's conv and stops bias-contaminated pad
    # columns leaking into res2.
    r1 = (xh[:, 1:TL + 3] + r1) * vm_ref[...]        # (C, TL+2) * (1, TL+2)

    # ---- residual block 2, computed on the central TL columns ----------------
    h2 = _leaky(r1)
    h2_cat = jnp.concatenate([h2[:, 0:TL], h2[:, 1:TL + 1], h2[:, 2:TL + 2]],
                             axis=0)                                  # (3C, TL)
    a2 = jnp.dot(w1b_ref[...], h2_cat.astype(mdt),
                 preferred_element_type=jnp.float32) + b1b_ref[...]   # (H, TL)
    a2 = _leaky(a2)
    r2 = jnp.dot(w2b_ref[...], a2.astype(mdt),
                 preferred_element_type=jnp.float32) + b2b_ref[...]   # (C, TL)
    r2 = r1[:, 1:TL + 1] + r2

    # ---- pre_vq_conv1 (k=1) + VQ nearest-neighbour lookup --------------------
    z = jnp.dot(wp_ref[...], r2.astype(mdt),
                preferred_element_type=jnp.float32) + bp_ref[...]     # (D, TL)

    e = e_ref[...]                                   # (K, D) codebook, f32
    Kn = e.shape[0]
    scores = jnp.dot(e, z, preferred_element_type=jnp.float32)        # (K, TL)
    dist = c2_ref[...] - 2.0 * scores    # ||z||^2 dropped: constant per column
    dmin = jnp.min(dist, axis=0, keepdims=True)                       # (1, TL)
    kio = lax.broadcasted_iota(jnp.int32, dist.shape, 0).astype(jnp.float32)
    cand = jnp.where(dist <= dmin, kio, jnp.float32(Kn))
    idx = jnp.min(cand, axis=0, keepdims=True)       # first minimizer (torch argmin)
    onehot = (kio == idx).astype(jnp.float32)                         # (K, TL)
    # Codebook lookup: contract over K against the same (K, D) codebook — no
    # duplicated transposed copy is shipped to the kernel.
    q = lax.dot_general(e, onehot, (((0,), (0,)), ((), ())),
                        preferred_element_type=jnp.float32)           # (D, TL)
    o_ref[...] = q.astype(o_ref.dtype)


# ---------------------------------------------------------------------------
# Wrapper: batch folding, halos, validity mask, weight prep, pallas_call.
# ---------------------------------------------------------------------------
def vqvae_inference_forward(x, params, *, tl=None, matmul_dtype=jnp.float32):
    """Fused res1 -> res2 -> pre_vq_conv1 -> VQ quantize.  NCL in, NCL out.

    `tl` forces the folded-length tile (testing); default is VMEM-budget driven.
    `matmul_dtype=jnp.bfloat16` uses bf16 MXU operands with f32 accumulation.
    """
    N, C, L = x.shape
    w1a, b1a, w2a, b2a = params["res1"]
    w1b, b1b, w2b, b2b = params["res2"]
    wp, bp = params["pre"]
    E = params["codebook"]
    H = w1a.shape[0]
    D = wp.shape[0]
    K = E.shape[0]
    assert w1a.shape == (H, C, 3) and w2a.shape == (C, H, 1)
    assert w1b.shape == (H, C, 3) and w2b.shape == (C, H, 1)
    assert wp.shape == (D, C, 1) and E.shape == (K, D)

    vmem_limit = _vmem_limit_bytes()
    Lpad = L + 1                       # one zero separator column per sample
    Lf0 = N * Lpad
    TL, JT = _plan_tiles(Lf0, _tile_budget_cols(C, H, D, K, vmem_limit), tl)
    Lf = JT * TL

    f32 = jnp.float32
    # Fold batch into length: (N, C, Lpad) -> (C, N*Lpad), zero-pad up to Lf.
    xp = jnp.pad(x.astype(f32), ((0, 0), (0, 0), (0, Lpad - L)))
    xf = jnp.transpose(xp, (1, 0, 2)).reshape(C, N * Lpad)
    if Lf > N * Lpad:
        xf = jnp.pad(xf, ((0, 0), (0, Lf - N * Lpad)))

    # Per-tile halo columns (2 per side), zero at the folded ends.
    xt = xf.reshape(C, JT, TL)
    z2 = jnp.zeros((C, 1, 2), f32)
    left = jnp.concatenate([z2, xt[:, :-1, TL - 2:TL]], axis=1)       # (C, JT, 2)
    right = jnp.concatenate([xt[:, 1:, 0:2], z2], axis=1)             # (C, JT, 2)
    halo = jnp.transpose(jnp.concatenate([left, right], axis=2), (1, 0, 2))

    # Per-tile validity mask over the haloed window [-1, TL+1): 1.0 where the
    # folded column maps to a within-sample position < L.  Precomputed on the
    # host (exact, and the kernel needs no vector integer mod).
    pos = jnp.arange(Lf)
    valid = ((pos % Lpad < L) & (pos < N * Lpad)).astype(f32)         # (Lf,)
    vc = valid.reshape(JT, TL)
    ze = jnp.zeros((1,), f32)
    le = jnp.concatenate([ze, valid[TL - 1::TL][:JT - 1]])            # (JT,)
    re = jnp.concatenate([valid[TL::TL][:JT - 1], ze])                # (JT,)
    vmask = jnp.concatenate([le[:, None], vc, re[:, None]], axis=1)[:, None, :]

    # Weights: conv1 taps flattened to (H, 3C) in [l-1, l, l+1] order and
    # pre-cast once to the MXU operand dtype (no per-grid-step casts in-kernel).
    def prep(w1, b1, w2, b2):
        return (jnp.transpose(w1, (0, 2, 1)).reshape(H, 3 * C).astype(matmul_dtype),
                b1.reshape(H, 1).astype(f32),
                w2[:, :, 0].astype(matmul_dtype),
                b2.reshape(C, 1).astype(f32))

    w1a_f, b1a_c, w2a_m, b2a_c = prep(w1a, b1a, w2a, b2a)
    w1b_f, b1b_c, w2b_m, b2b_c = prep(w1b, b1b, w2b, b2b)
    wp_m = wp[:, :, 0].astype(matmul_dtype)
    bp_c = bp.reshape(D, 1).astype(f32)
    Ef = E.astype(f32)                               # codebook kept f32 (argmin)
    c2 = jnp.sum(Ef * Ef, axis=1, keepdims=True)     # (K, 1), hoisted out of kernel

    cm = lambda j: (0, 0)                            # weights: resident, loaded once
    of = pl.pallas_call(
        _fused_vqvae_kernel,
        out_shape=jax.ShapeDtypeStruct((D, Lf), f32),
        grid_spec=pltpu.PrefetchScalarGridSpec(
            num_scalar_prefetch=0,
            grid=(JT,),
            in_specs=[
                pl.BlockSpec((C, TL), lambda j: (0, j)),
                pl.BlockSpec((pl.Squeezed(), C, 4), lambda j: (j, 0, 0)),
                pl.BlockSpec((pl.Squeezed(), 1, TL + 2), lambda j: (j, 0, 0)),
                pl.BlockSpec((H, 3 * C), cm),
                pl.BlockSpec((H, 1), cm),
                pl.BlockSpec((C, H), cm),
                pl.BlockSpec((C, 1), cm),
                pl.BlockSpec((H, 3 * C), cm),
                pl.BlockSpec((H, 1), cm),
                pl.BlockSpec((C, H), cm),
                pl.BlockSpec((C, 1), cm),
                pl.BlockSpec((D, C), cm),
                pl.BlockSpec((D, 1), cm),
                pl.BlockSpec((K, D), cm),
                pl.BlockSpec((K, 1), cm),
            ],
            out_specs=pl.BlockSpec((D, TL), lambda j: (0, j)),
        ),
        compiler_params=pltpu.CompilerParams(
            dimension_semantics=("parallel",),
            vmem_limit_bytes=vmem_limit,
        ),
    )(xf, halo, vmask, w1a_f, b1a_c, w2a_m, b2a_c,
      w1b_f, b1b_c, w2b_m, b2b_c, wp_m, bp_c, Ef, c2)

    out = jnp.transpose(of[:, :N * Lpad].reshape(D, N, Lpad), (1, 0, 2))
    return out[:, :, :L].astype(x.dtype)


# ---------------------------------------------------------------------------
# Pure-JAX reference (mirrors the PyTorch forward exactly)
# ---------------------------------------------------------------------------
def _conv1d_ref(x, w, b, pad):
    N, C, L = x.shape
    O, _, k = w.shape
    xp = jnp.pad(x, ((0, 0), (0, 0), (pad, pad)))
    out = jnp.broadcast_to(b[None, :, None], (N, O, L)).astype(jnp.float32)
    for t in range(k):
        out = out + jnp.einsum("ncl,oc->nol", xp[:, :, t:t + L], w[:, :, t])
    return out


def _residual_ref(x, w1, b1, w2, b2):
    h = _leaky(x)
    h = _leaky(_conv1d_ref(h, w1, b1, pad=1))
    h = _conv1d_ref(h, w2, b2, pad=0)
    return x + h


def vqvae_inference_reference(x, params):
    h = _residual_ref(x, *params["res1"])
    h = _residual_ref(h, *params["res2"])
    wp, bp = params["pre"]
    z = _conv1d_ref(h, wp, bp, pad=0)                  # (N, D, L)
    zp = jnp.transpose(z, (0, 2, 1))                   # permute(0, 2, 1)
    E = params["codebook"]
    d = (jnp.sum(zp * zp, axis=-1, keepdims=True)
         - 2.0 * jnp.einsum("nld,kd->nlk", zp, E)
         + jnp.sum(E * E, axis=-1)[None, None, :])
    idx = jnp.argmin(d, axis=-1)                       # (N, L)
    q = E[idx]                                         # (N, L, D)
    return jnp.transpose(q, (0, 2, 1))                 # permute back to NCL


# ---------------------------------------------------------------------------
# Test
# ---------------------------------------------------------------------------
def _make_params(key, C, R, D, K):
    ks = jax.random.split(key, 11)

    def res(k0, k1, k2, k3):
        return (0.1 * jax.random.normal(k0, (R, C, 3), jnp.float32),
                0.1 * jax.random.normal(k1, (R,), jnp.float32),
                0.1 * jax.random.normal(k2, (C, R, 1), jnp.float32),
                0.1 * jax.random.normal(k3, (C,), jnp.float32))

    return {
        "res1": res(ks[0], ks[1], ks[2], ks[3]),
        "res2": res(ks[4], ks[5], ks[6], ks[7]),
        "pre": (0.1 * jax.random.normal(ks[8], (D, C, 1), jnp.float32),
                0.1 * jax.random.normal(ks[9], (D,), jnp.float32)),
        "codebook": jax.random.normal(ks[10], (K, D), jnp.float32),
    }


if __name__ == "__main__":
    key = jax.random.PRNGKey(0)
    kx, kp, kx2 = jax.random.split(key, 3)

    # batch=2, in_channels=hidden_dim=8, L=16, residual hidden=16,
    # embedding_dim=8, codebook size=32.
    N, C, L, R, D, K = 2, 8, 16, 16, 8, 32
    params = _make_params(kp, C, R, D, K)
    x = jax.random.normal(kx, (N, C, L), jnp.float32)

    # 1) Full fused forward, f32, single batch-folded tile.
    out = jax.block_until_ready(vqvae_inference_forward(x, params))
    ref = vqvae_inference_reference(x, params)
    assert out.shape == (N, D, L)
    assert jnp.allclose(out, ref, atol=1e-4, rtol=1e-4), "f32 forward mismatch"

    # 2) Forced L-tiling (TL=128, L=300): tile boundaries fall mid-sample, so the
    #    cross-tile halos + separator-column masking path is exercised.
    L2 = 300
    x2 = jax.random.normal(kx2, (N, C, L2), jnp.float32)
    out2 = jax.block_until_ready(vqvae_inference_forward(x2, params, tl=128))
    ref2 = vqvae_inference_reference(x2, params)
    assert out2.shape == (N, D, L2)
    assert jnp.allclose(out2, ref2, atol=1e-4, rtol=1e-4), "tiled forward mismatch"

    # 3) bf16 MXU operands (f32 accumulation) smoke test; argmin near-ties may
    #    flip a codeword vs. the f32 reference, so only shape/finiteness checked.
    out3 = jax.block_until_ready(
        vqvae_inference_forward(x, params, matmul_dtype=jnp.bfloat16))
    assert out3.shape == (N, D, L)
    assert bool(jnp.all(jnp.isfinite(out3))), "bf16 forward produced non-finite"

    print("KERNEL_OK")
</pallas_src>

<mosaic_0001>
module attributes {stable_mosaic.version = 11 : i64} {
  func.func @_fused_vqvae_kernel(%arg0: i32, %arg1: memref<8x128xf32, #tpu.memory_space<vmem>>, %arg2: memref<1x8x4xf32, #tpu.memory_space<vmem>>, %arg3: memref<1x1x130xf32, #tpu.memory_space<vmem>>, %arg4: memref<16x24xf32, #tpu.memory_space<vmem>>, %arg5: memref<16x1xf32, #tpu.memory_space<vmem>>, %arg6: memref<8x16xf32, #tpu.memory_space<vmem>>, %arg7: memref<8x1xf32, #tpu.memory_space<vmem>>, %arg8: memref<16x24xf32, #tpu.memory_space<vmem>>, %arg9: memref<16x1xf32, #tpu.memory_space<vmem>>, %arg10: memref<8x16xf32, #tpu.memory_space<vmem>>, %arg11: memref<8x1xf32, #tpu.memory_space<vmem>>, %arg12: memref<8x8xf32, #tpu.memory_space<vmem>>, %arg13: memref<8x1xf32, #tpu.memory_space<vmem>>, %arg14: memref<32x8xf32, #tpu.memory_space<vmem>>, %arg15: memref<32x1xf32, #tpu.memory_space<vmem>>, %arg16: memref<8x128xf32, #tpu.memory_space<vmem>>) attributes {dimension_semantics = [#tpu.dimension_semantics<parallel>], iteration_bounds = array<i64: 1>, scalar_prefetch = 0 : i64, scratch_operands = 0 : i64, tpu.core_type = #tpu.core_type<tc>, window_params = [{transform_indices = @transform_0, window_bounds = array<i64: 8, 128>}, {transform_indices = @transform_1, window_bounds = array<i64: 1, 8, 4>}, {transform_indices = @transform_2, window_bounds = array<i64: 1, 1, 130>}, {pipeline_mode = #tpu.pipeline_mode<synchronous>, transform_indices = @transform_3, window_bounds = array<i64: 16, 24>}, {pipeline_mode = #tpu.pipeline_mode<synchronous>, transform_indices = @transform_4, window_bounds = array<i64: 16, 1>}, {pipeline_mode = #tpu.pipeline_mode<synchronous>, transform_indices = @transform_5, window_bounds = array<i64: 8, 16>}, {pipeline_mode = #tpu.pipeline_mode<synchronous>, transform_indices = @transform_6, window_bounds = array<i64: 8, 1>}, {pipeline_mode = #tpu.pipeline_mode<synchronous>, transform_indices = @transform_7, window_bounds = array<i64: 16, 24>}, {pipeline_mode = #tpu.pipeline_mode<synchronous>, transform_indices = @transform_8, window_bounds = array<i64: 16, 1>}, {pipeline_mode = #tpu.pipeline_mode<synchronous>, transform_indices = @transform_9, window_bounds = array<i64: 8, 16>}, {pipeline_mode = #tpu.pipeline_mode<synchronous>, transform_indices = @transform_10, window_bounds = array<i64: 8, 1>}, {pipeline_mode = #tpu.pipeline_mode<synchronous>, transform_indices = @transform_11, window_bounds = array<i64: 8, 8>}, {pipeline_mode = #tpu.pipeline_mode<synchronous>, transform_indices = @transform_12, window_bounds = array<i64: 8, 1>}, {pipeline_mode = #tpu.pipeline_mode<synchronous>, transform_indices = @transform_13, window_bounds = array<i64: 32, 8>}, {pipeline_mode = #tpu.pipeline_mode<synchronous>, transform_indices = @transform_14, window_bounds = array<i64: 32, 1>}, {transform_indices = @transform_15, window_bounds = array<i64: 8, 128>}]} {
    %c0 = arith.constant 0 : index
    %c0_0 = arith.constant 0 : index
    %0 = vector.load %arg1[%c0, %c0_0] : memref<8x128xf32, #tpu.memory_space<vmem>>, vector<8x128xf32>
    %c0_1 = arith.constant 0 : index
    %c0_2 = arith.constant 0 : index
    %c0_3 = arith.constant 0 : index
    %1 = vector.load %arg2[%c0_1, %c0_2, %c0_3] : memref<1x8x4xf32, #tpu.memory_space<vmem>>, vector<1x8x4xf32>
    %2 = vector.shape_cast %1 : vector<1x8x4xf32> to vector<8x4xf32>
    %3 = vector.extract_strided_slice %2 {offsets = [0, 0], sizes = [8, 2], strides = [1, 1]} : vector<8x4xf32> to vector<8x2xf32>
    %4 = vector.extract_strided_slice %2 {offsets = [0, 2], sizes = [8, 2], strides = [1, 1]} : vector<8x4xf32> to vector<8x2xf32>
    %5 = tpu.concatenate %3, %0, %4 in 1 : vector<8x2xf32>, vector<8x128xf32>, vector<8x2xf32> -> vector<8x132xf32>
    %cst = arith.constant 0.000000e+00 : f32
    %6 = vector.broadcast %cst : f32 to vector<8x132xf32>
    %7 = arith.cmpf ogt, %5, %6 : vector<8x132xf32>
    %cst_4 = arith.constant 2.000000e-01 : f32
    %8 = vector.broadcast %cst_4 : f32 to vector<8x132xf32>
    %9 = arith.mulf %8, %5 : vector<8x132xf32>
    %10 = arith.select %7, %5, %9 : vector<8x132xi1>, vector<8x132xf32>
    %11 = vector.extract_strided_slice %10 {offsets = [0, 0], sizes = [8, 130], strides = [1, 1]} : vector<8x132xf32> to vector<8x130xf32>
    %12 = vector.extract_strided_slice %10 {offsets = [0, 1], sizes = [8, 130], strides = [1, 1]} : vector<8x132xf32> to vector<8x130xf32>
    %13 = vector.extract_strided_slice %10 {offsets = [0, 2], sizes = [8, 130], strides = [1, 1]} : vector<8x132xf32> to vector<8x130xf32>
    %14 = tpu.concatenate %11, %12, %13 in 0 : vector<8x130xf32>, vector<8x130xf32>, vector<8x130xf32> -> vector<24x130xf32>
    %c0_5 = arith.constant 0 : index
    %c0_6 = arith.constant 0 : index
    %15 = vector.load %arg4[%c0_5, %c0_6] : memref<16x24xf32, #tpu.memory_space<vmem>>, vector<16x24xf32>
    %cst_7 = arith.constant dense<0.000000e+00> : vector<16x130xf32>
    %16 = tpu.matmul %15, %14, %cst_7 {dimension_numbers = #tpu.dot_dimension_numbers<[1], [0], [0], [1], [0, 0, 1, 1], [], []>} : vector<16x24xf32>, vector<24x130xf32>, vector<16x130xf32> -> vector<16x130xf32>
    %c0_8 = arith.constant 0 : index
    %c0_9 = arith.constant 0 : index
    %17 = vector.load %arg5[%c0_8, %c0_9] : memref<16x1xf32, #tpu.memory_space<vmem>>, vector<16x1xf32>
    %18 = vector.broadcast %17 : vector<16x1xf32> to vector<16x130xf32>
    %19 = arith.addf %16, %18 : vector<16x130xf32>
    %cst_10 = arith.constant 0.000000e+00 : f32
    %20 = vector.broadcast %cst_10 : f32 to vector<16x130xf32>
    %21 = arith.cmpf ogt, %19, %20 : vector<16x130xf32>
    %cst_11 = arith.constant 2.000000e-01 : f32
    %22 = vector.broadcast %cst_11 : f32 to vector<16x130xf32>
    %23 = arith.mulf %22, %19 : vector<16x130xf32>
    %24 = arith.select %21, %19, %23 : vector<16x130xi1>, vector<16x130xf32>
    %c0_12 = arith.constant 0 : index
    %c0_13 = arith.constant 0 : index
    %25 = vector.load %arg6[%c0_12, %c0_13] : memref<8x16xf32, #tpu.memory_space<vmem>>, vector<8x16xf32>
    %cst_14 = arith.constant dense<0.000000e+00> : vector<8x130xf32>
    %26 = tpu.matmul %25, %24, %cst_14 {dimension_numbers = #tpu.dot_dimension_numbers<[1], [0], [0], [1], [0, 0, 1, 1], [], []>} : vector<8x16xf32>, vector<16x130xf32>, vector<8x130xf32> -> vector<8x130xf32>
    %c0_15 = arith.constant 0 : index
    %c0_16 = arith.constant 0 : index
    %27 = vector.load %arg7[%c0_15, %c0_16] : memref<8x1xf32, #tpu.memory_space<vmem>>, vector<8x1xf32>
    %28 = vector.broadcast %27 : vector<8x1xf32> to vector<8x130xf32>
    %29 = arith.addf %26, %28 : vector<8x130xf32>
    %30 = vector.extract_strided_slice %5 {offsets = [0, 1], sizes = [8, 130], strides = [1, 1]} : vector<8x132xf32> to vector<8x130xf32>
    %31 = arith.addf %30, %29 : vector<8x130xf32>
    %c0_17 = arith.constant 0 : index
    %c0_18 = arith.constant 0 : index
    %c0_19 = arith.constant 0 : index
    %32 = vector.load %arg3[%c0_17, %c0_18, %c0_19] : memref<1x1x130xf32, #tpu.memory_space<vmem>>, vector<1x1x130xf32>
    %33 = vector.shape_cast %32 : vector<1x1x130xf32> to vector<1x130xf32>
    %34 = vector.broadcast %33 : vector<1x130xf32> to vector<8x130xf32>
    %35 = arith.mulf %31, %34 : vector<8x130xf32>
    %cst_20 = arith.constant 0.000000e+00 : f32
    %36 = vector.broadcast %cst_20 : f32 to vector<8x130xf32>
    %37 = arith.cmpf ogt, %35, %36 : vector<8x130xf32>
    %cst_21 = arith.constant 2.000000e-01 : f32
    %38 = vector.broadcast %cst_21 : f32 to vector<8x130xf32>
    %39 = arith.mulf %38, %35 : vector<8x130xf32>
    %40 = arith.select %37, %35, %39 : vector<8x130xi1>, vector<8x130xf32>
    %41 = vector.extract_strided_slice %40 {offsets = [0, 0], sizes = [8, 128], strides = [1, 1]} : vector<8x130xf32> to vector<8x128xf32>
    %42 = vector.extract_strided_slice %40 {offsets = [0, 1], sizes = [8, 128], strides = [1, 1]} : vector<8x130xf32> to vector<8x128xf32>
    %43 = vector.extract_strided_slice %40 {offsets = [0, 2], sizes = [8, 128], strides = [1, 1]} : vector<8x130xf32> to vector<8x128xf32>
    %44 = tpu.concatenate %41, %42, %43 in 0 : vector<8x128xf32>, vector<8x128xf32>, vector<8x128xf32> -> vector<24x128xf32>
    %c0_22 = arith.constant 0 : index
    %c0_23 = arith.constant 0 : index
    %45 = vector.load %arg8[%c0_22, %c0_23] : memref<16x24xf32, #tpu.memory_space<vmem>>, vector<16x24xf32>
    %cst_24 = arith.constant dense<0.000000e+00> : vector<16x128xf32>
    %46 = tpu.matmul %45, %44, %cst_24 {dimension_numbers = #tpu.dot_dimension_numbers<[1], [0], [0], [1], [0, 0, 1, 1], [], []>} : vector<16x24xf32>, vector<24x128xf32>, vector<16x128xf32> -> vector<16x128xf32>
    %c0_25 = arith.constant 0 : index
    %c0_26 = arith.constant 0 : index
    %47 = vector.load %arg9[%c0_25, %c0_26] : memref<16x1xf32, #tpu.memory_space<vmem>>, vector<16x1xf32>
    %48 = vector.broadcast %47 : vector<16x1xf32> to vector<16x128xf32>
    %49 = arith.addf %46, %48 : vector<16x128xf32>
    %cst_27 = arith.constant 0.000000e+00 : f32
    %50 = vector.broadcast %cst_27 : f32 to vector<16x128xf32>
    %51 = arith.cmpf ogt, %49, %50 : vector<16x128xf32>
    %cst_28 = arith.constant 2.000000e-01 : f32
    %52 = vector.broadcast %cst_28 : f32 to vector<16x128xf32>
    %53 = arith.mulf %52, %49 : vector<16x128xf32>
    %54 = arith.select %51, %49, %53 : vector<16x128xi1>, vector<16x128xf32>
    %c0_29 = arith.constant 0 : index
    %c0_30 = arith.constant 0 : index
    %55 = vector.load %arg10[%c0_29, %c0_30] : memref<8x16xf32, #tpu.memory_space<vmem>>, vector<8x16xf32>
    %cst_31 = arith.constant dense<0.000000e+00> : vector<8x128xf32>
    %56 = tpu.matmul %55, %54, %cst_31 {dimension_numbers = #tpu.dot_dimension_numbers<[1], [0], [0], [1], [0, 0, 1, 1], [], []>} : vector<8x16xf32>, vector<16x128xf32>, vector<8x128xf32> -> vector<8x128xf32>
    %c0_32 = arith.constant 0 : index
    %c0_33 = arith.constant 0 : index
    %57 = vector.load %arg11[%c0_32, %c0_33] : memref<8x1xf32, #tpu.memory_space<vmem>>, vector<8x1xf32>
    %58 = vector.broadcast %57 : vector<8x1xf32> to vector<8x128xf32>
    %59 = arith.addf %56, %58 : vector<8x128xf32>
    %60 = vector.extract_strided_slice %35 {offsets = [0, 1], sizes = [8, 128], strides = [1, 1]} : vector<8x130xf32> to vector<8x128xf32>
    %61 = arith.addf %60, %59 : vector<8x128xf32>
    %c0_34 = arith.constant 0 : index
    %c0_35 = arith.constant 0 : index
    %62 = vector.load %arg12[%c0_34, %c0_35] : memref<8x8xf32, #tpu.memory_space<vmem>>, vector<8x8xf32>
    %cst_36 = arith.constant dense<0.000000e+00> : vector<8x128xf32>
    %63 = tpu.matmul %62, %61, %cst_36 {dimension_numbers = #tpu.dot_dimension_numbers<[1], [0], [0], [1], [0, 0, 1, 1], [], []>} : vector<8x8xf32>, vector<8x128xf32>, vector<8x128xf32> -> vector<8x128xf32>
    %c0_37 = arith.constant 0 : index
    %c0_38 = arith.constant 0 : index
    %64 = vector.load %arg13[%c0_37, %c0_38] : memref<8x1xf32, #tpu.memory_space<vmem>>, vector<8x1xf32>
    %65 = vector.broadcast %64 : vector<8x1xf32> to vector<8x128xf32>
    %66 = arith.addf %63, %65 : vector<8x128xf32>
    %c0_39 = arith.constant 0 : index
    %c0_40 = arith.constant 0 : index
    %67 = vector.load %arg14[%c0_39, %c0_40] : memref<32x8xf32, #tpu.memory_space<vmem>>, vector<32x8xf32>
    %cst_41 = arith.constant dense<0.000000e+00> : vector<32x128xf32>
    %68 = tpu.matmul %67, %66, %cst_41 {dimension_numbers = #tpu.dot_dimension_numbers<[1], [0], [0], [1], [0, 0, 1, 1], [], []>} : vector<32x8xf32>, vector<8x128xf32>, vector<32x128xf32> -> vector<32x128xf32>
    %c0_42 = arith.constant 0 : index
    %c0_43 = arith.constant 0 : index
    %69 = vector.load %arg15[%c0_42, %c0_43] : memref<32x1xf32, #tpu.memory_space<vmem>>, vector<32x1xf32>
    %cst_44 = arith.constant 2.000000e+00 : f32
    %70 = vector.broadcast %cst_44 : f32 to vector<32x128xf32>
    %71 = arith.mulf %70, %68 : vector<32x128xf32>
    %72 = vector.broadcast %69 : vector<32x1xf32> to vector<32x128xf32>
    %73 = arith.subf %72, %71 : vector<32x128xf32>
    %cst_45 = arith.constant dense<0x7F800000> : vector<128xf32>
    %74 = vector.multi_reduction <minimumf>, %73, %cst_45 [0] : vector<32x128xf32> to vector<128xf32>
    %75 = vector.shape_cast %74 : vector<128xf32> to vector<1x128xf32>
    %76 = tpu.iota {dimensions = array<i32: 0>} : vector<32x128xi32>
    %77 = arith.sitofp %76 : vector<32x128xi32> to vector<32x128xf32>
    %78 = vector.broadcast %75 : vector<1x128xf32> to vector<32x128xf32>
    %79 = arith.cmpf ole, %73, %78 : vector<32x128xf32>
    %cst_46 = arith.constant 3.200000e+01 : f32
    %80 = vector.broadcast %cst_46 : f32 to vector<32x128xf32>
    %81 = arith.select %79, %77, %80 : vector<32x128xi1>, vector<32x128xf32>
    %cst_47 = arith.constant dense<0x7F800000> : vector<128xf32>
    %82 = vector.multi_reduction <minimumf>, %81, %cst_47 [0] : vector<32x128xf32> to vector<128xf32>
    %83 = vector.shape_cast %82 : vector<128xf32> to vector<1x128xf32>
    %84 = vector.broadcast %83 : vector<1x128xf32> to vector<32x128xf32>
    %85 = arith.cmpf oeq, %77, %84 : vector<32x128xf32>
    %86 = arith.extui %85 : vector<32x128xi1> to vector<32x128xi32>
    %87 = arith.sitofp %86 : vector<32x128xi32> to vector<32x128xf32>
    %cst_48 = arith.constant dense<0.000000e+00> : vector<8x128xf32>
    %88 = tpu.matmul %67, %87, %cst_48 {dimension_numbers = #tpu.dot_dimension_numbers<[0], [0], [1], [1], [0, 1, 1, 1], [], []>} : vector<32x8xf32>, vector<32x128xf32>, vector<8x128xf32> -> vector<8x128xf32>
    %c0_49 = arith.constant 0 : index
    %c0_50 = arith.constant 0 : index
    %89 = vector.load %arg16[%c0_49, %c0_50] : memref<8x128xf32, #tpu.memory_space<vmem>>, vector<8x128xf32>
    tpu.vector_store %arg16[%c0_49, %c0_50], %88 {strides = array<i32>} : memref<8x128xf32, #tpu.memory_space<vmem>>, vector<8x128xf32>,
    return
  }
  func.func @transform_0(%arg0: i32) -> (i32, i32) {
    %c0_i32 = arith.constant 0 : i32
    %c0_i32_0 = arith.constant 0 : i32
    return %c0_i32, %arg0 : i32, i32
  }
  func.func @transform_1(%arg0: i32) -> (i32, i32, i32) {
    %c0_i32 = arith.constant 0 : i32
    %c0_i32_0 = arith.constant 0 : i32
    %c0_i32_1 = arith.constant 0 : i32
    return %arg0, %c0_i32, %c0_i32_0 : i32, i32, i32
  }
  func.func @transform_2(%arg0: i32) -> (i32, i32, i32) {
    %c0_i32 = arith.constant 0 : i32
    %c0_i32_0 = arith.constant 0 : i32
    %c0_i32_1 = arith.constant 0 : i32
    return %arg0, %c0_i32, %c0_i32_0 : i32, i32, i32
  }
  func.func @transform_3(%arg0: i32) -> (i32, i32) {
    %c0_i32 = arith.constant 0 : i32
    %c0_i32_0 = arith.constant 0 : i32
    %c0_i32_1 = arith.constant 0 : i32
    return %c0_i32, %c0_i32_0 : i32, i32
  }
  func.func @transform_4(%arg0: i32) -> (i32, i32) {
    %c0_i32 = arith.constant 0 : i32
    %c0_i32_0 = arith.constant 0 : i32
    %c0_i32_1 = arith.constant 0 : i32
    return %c0_i32, %c0_i32_0 : i32, i32
  }
  func.func @transform_5(%arg0: i32) -> (i32, i32) {
    %c0_i32 = arith.constant 0 : i32
    %c0_i32_0 = arith.constant 0 : i32
    %c0_i32_1 = arith.constant 0 : i32
    return %c0_i32, %c0_i32_0 : i32, i32
  }
  func.func @transform_6(%arg0: i32) -> (i32, i32) {
    %c0_i32 = arith.constant 0 : i32
    %c0_i32_0 = arith.constant 0 : i32
    %c0_i32_1 = arith.constant 0 : i32
    return %c0_i32, %c0_i32_0 : i32, i32
  }
  func.func @transform_7(%arg0: i32) -> (i32, i32) {
    %c0_i32 = arith.constant 0 : i32
    %c0_i32_0 = arith.constant 0 : i32
    %c0_i32_1 = arith.constant 0 : i32
    return %c0_i32, %c0_i32_0 : i32, i32
  }
  func.func @transform_8(%arg0: i32) -> (i32, i32) {
    %c0_i32 = arith.constant 0 : i32
    %c0_i32_0 = arith.constant 0 : i32
    %c0_i32_1 = arith.constant 0 : i32
    return %c0_i32, %c0_i32_0 : i32, i32
  }
  func.func @transform_9(%arg0: i32) -> (i32, i32) {
    %c0_i32 = arith.constant 0 : i32
    %c0_i32_0 = arith.constant 0 : i32
    %c0_i32_1 = arith.constant 0 : i32
    return %c0_i32, %c0_i32_0 : i32, i32
  }
  func.func @transform_10(%arg0: i32) -> (i32, i32) {
    %c0_i32 = arith.constant 0 : i32
    %c0_i32_0 = arith.constant 0 : i32
    %c0_i32_1 = arith.constant 0 : i32
    return %c0_i32, %c0_i32_0 : i32, i32
  }
  func.func @transform_11(%arg0: i32) -> (i32, i32) {
    %c0_i32 = arith.constant 0 : i32
    %c0_i32_0 = arith.constant 0 : i32
    %c0_i32_1 = arith.constant 0 : i32
    return %c0_i32, %c0_i32_0 : i32, i32
  }
  func.func @transform_12(%arg0: i32) -> (i32, i32) {
    %c0_i32 = arith.constant 0 : i32
    %c0_i32_0 = arith.constant 0 : i32
    %c0_i32_1 = arith.constant 0 : i32
    return %c0_i32, %c0_i32_0 : i32, i32
  }
  func.func @transform_13(%arg0: i32) -> (i32, i32) {
    %c0_i32 = arith.constant 0 : i32
    %c0_i32_0 = arith.constant 0 : i32
    %c0_i32_1 = arith.constant 0 : i32
    return %c0_i32, %c0_i32_0 : i32, i32
  }
  func.func @transform_14(%arg0: i32) -> (i32, i32) {
    %c0_i32 = arith.constant 0 : i32
    %c0_i32_0 = arith.constant 0 : i32
    %c0_i32_1 = arith.constant 0 : i32
    return %c0_i32, %c0_i32_0 : i32, i32
  }
  func.func @transform_15(%arg0: i32) -> (i32, i32) {
    %c0_i32 = arith.constant 0 : i32
    %c0_i32_0 = arith.constant 0 : i32
    return %c0_i32, %arg0 : i32, i32
  }
}

</mosaic_0001>

<bundles_post_ra>
// kernel: tpu_custom_call.1
= control target key start
LH: loop header
LB: loop body
LE: loop exit
PB: predicated region body
PF: predicated region fallthrough
CT: control target
= control target key end

     0   :  { %s690_s20 = smov 2   ;;  %s909_s0 = inlined_call_operand.vmem [shape: f32[8,128], index: 0, kind: input, shape index: {}]   ;;  %s910_s1 = inlined_call_operand.vmem [shape: f32[1,8,4], index: 1, kind: input, shape index: {}]   ;;  %s911_s2 = inlined_call_operand.vmem [shape: f32[1,1,130], index: 2, kind: input, shape index: {}]   ;;  %s912_s3 = inlined_call_operand.vmem [shape: f32[16,24], index: 3, kind: input, shape index: {}]   ;;  %s913_s4 = inlined_call_operand.vmem [shape: f32[16,1], index: 4, kind: input, shape index: {}]   ;;  %s914_s5 = inlined_call_operand.vmem [shape: f32[8,16], index: 5, kind: input, shape index: {}]   ;;  %s915_s6 = inlined_call_operand.vmem [shape: f32[8,1], index: 6, kind: input, shape index: {}]   ;;  %s916_s7 = inlined_call_operand.vmem [shape: f32[16,24], index: 7, kind: input, shape index: {}]   ;;  %s917_s8 = inlined_call_operand.vmem [shape: f32[16,1], index: 8, kind: input, shape index: {}]   ;;  %s918_s9 = inlined_call_operand.vmem [shape: f32[8,16], index: 9, kind: input, shape index: {}]   ;;  %s919_s10 = inlined_call_operand.vmem [shape: f32[8,1], index: 10, kind: input, shape index: {}]   ;;  %s920_s11 = inlined_call_operand.vmem [shape: f32[8,8], index: 11, kind: input, shape index: {}]   ;;  %s921_s12 = inlined_call_operand.vmem [shape: f32[8,1], index: 12, kind: input, shape index: {}]   ;;  %s922_s13 = inlined_call_operand.vmem [shape: f32[32,8], index: 13, kind: input, shape index: {}]   ;;  %s923_s14 = inlined_call_operand.vmem [shape: f32[32,1], index: 14, kind: input, shape index: {}]   ;;  %s924_s15 = inlined_call_operand.hbm [shape: f32[8,128], index: 15, kind: output, shape index: {}]  }
   0x1   :  { %v51_v0 = vld [vmem:[%s909_s0] sm:$0xff] }
   0x2   :  { %54 = vrot.lane.b32.xlu0 %v51_v0, %s690_s20 }
   0x3   :  { %20 = vsyncpa [#allocation3], 0  ;;  %v52_v1 = vld [vmem:[%s910_s1] sm:$0xff]  ;;  %vm57_vm0 = vcmask 15360   ;;  %s691_s0 = smov 127   ;;  %s692_s1 = smov 126  }
   0x4   :  { %v87_v10 = vld [vmem:[%s913_s4 + $0x8] sm:$0xff]  ;;  %v86_v11 = vld [vmem:[%s913_s4] sm:$0xff]  ;;  %v693_v12 = vmov 0   ;;  %vm80_vm3 = vcmask 1031168   ;;  %vm72_vm4 = vcmask 1039360   ;;  %vm98_vm5 = vcmask 195584  }
   0x5   :  { %636 = vset.pattern.permute.xlu1 %v693_v12  ;;  %637 = vset.pattern.permute.xlu2 %v693_v12  ;;  %v164_v13 = vld [vmem:[%s915_s6] sm:$0xff]  ;;  %v85_v23 = vld [vmem:[%s912_s3 + $0x8] sm:$0xff]  ;;  %vm170_vm10 = vcmask 130048   ;;  %s694_s19 = smov 1   ;;  %vm220_vm11 = vcmask 7168   ;;  %s582_s25 = sshll.u32 %s924_s15, 4  ;;  %s583_s25 = int_to_ptr.hbm [resolvable:$true] %s582_s25 }
   0x6   :  { %90 = vperm.xlu2 %637, %v86_v11   ;;  %658 = vset.pattern.permute.xlu0 %v693_v12  ;;  %v84_v22 = vld [vmem:[%s912_s3] sm:$0xff] }
   0x7   :  { %v163_v40 = vld [vmem:[%s914_s5] sm:$0xff] }
   0x8   :  { %v226_v43 = vld [vmem:[%s911_s2] sm:$0x3] }
   0x9   :  { %v228_v44 = vperm.slane %v226_v43, 0  ;;  %v229_v50 = vperm.slane %v226_v43, 1 }
   0xe   :  { %167 = vperm.xlu2 %637, %v164_v13  }
  0x16   :  { %230 = vrot.lane.b32.xlu2 %v228_v44, %s694_s19 }
  0x60   :  { %v91_v26 = vpop.permute.xlu2 %90 }
  0x68   :  { %v168_v45 = vpop.permute.xlu2 %167 }
  0x70   :  { %v231_v54 = vpop.permute.xlu2 %230 }
  0x74   :  { %v55_v2 = vpop.permute.xlu0 %54 }
  0x75   :  { %v784_v3 = vsel %vm57_vm0, %v52_v1, %v55_v2  ;;  %v786_v4 = vsel %vm57_vm0, %v55_v2, %v52_v1  ;;  %v260_v2 = vld [vmem:[%s917_s8 + $0x8] sm:$0xff]  ;;  %vm370_vm0 = vcmask 64512  }
  0x76   :  { %vm60_vm1 = vcmp.gt.f32.partialorder %v784_v3, 0.0  ;;  %vm61_vm2 = vcmp.gt.f32.partialorder %v786_v4, 0.0  ;;  %v62_v5 = vmul.f32 0.2, %v784_v3  ;;  %v63_v6 = vmul.f32 0.2, %v786_v4 }
  0x78   :  { %v64_v7 = vsel %vm60_vm1, %v784_v3, %v62_v5  ;;  %v65_v8 = vsel %vm61_vm2, %v786_v4, %v63_v6 }
  0x79   :  { %v631_v9 = vpack.i.bf16 %v65_v8, %v64_v7 }
  0x7b   :  { %632 = vrot.lane.b32.xlu1 %v631_v9, %s691_s0  ;;  %627 = vrot.lane.b32.xlu0 %v631_v9, %s692_s1 }
  0x83   :  { %95 = vperm.xlu1 %636, %v87_v10  }
  0xed   :  { %v633_v14 = vpop.permute.xlu1 %632  ;;  %v628_v15 = vpop.permute.xlu0 %627 }
  0xee   :  { %v634_v16 = vunpack.i.l.bf16 %v633_v14  ;;  %v629_v17 = vunpack.i.l.bf16 %v628_v15  ;;  %v630_v18 = vunpack.i.h.bf16 %v628_v15  ;;  %v635_v19 = vunpack.i.h.bf16 %v633_v14  ;;  %v259_v14 = vld [vmem:[%s917_s8] sm:$0xff] }
  0xef   :  { %v439_v15 = vld [vmem:[%s923_s14] sm:$0xff] }
  0xf0   :  { %141 = vmatpush.msra.mxu1 %v630_v18  ;;  %v81_v20 = vsel %vm80_vm3, %v629_v17, %v630_v18  ;;  %v73_v21 = vsel %vm72_vm4, %v634_v16, %v635_v19  ;;  %v442_v16 = vld [vmem:[%s923_s14 + $0x18] sm:$0xff] }
  0xf1   :  { %118 = vmatpush.msra.mxu0 %v81_v20 }
  0xf2   :  { %142 = vmatpush.msra.mxu1 %v635_v19 }
  0xf3   :  { %119 = vmatpush.msra.mxu0 %v73_v21 }
  0xf4   :  { %143 = vmatpush.msra.mxu1 %v65_v8  ;;  %v320_v8 = vld [vmem:[%s919_s10] sm:$0xff] }
  0xf5   :  { %120 = vmatpush.msra.mxu0 %v64_v7  ;;  %593 = vmatmul.msk.f32.vlgmr.msra.gmra.mxu1 %vm98_vm5, %v84_v22  ;;  %v96_v27 = vpop.permute.xlu1 %95 }
  0xf6   :  { %591 = vmatmul.msk.f32.vlgmr.msra.gmra.mxu0 %vm98_vm5, %v84_v22 }
  0xfd   :  { %594 = vmatmul.msk.f32.gmra.mxu1 %vm98_vm5, %v85_v23 }
  0xfe   :  { %592 = vmatmul.msk.f32.gmra.mxu0 %vm98_vm5, %v85_v23 }
 0x172   :  { %v145_v24 = vpop.f32.mrf.mxu1 }
 0x173   :  { %v122_v25 = vpop.f32.mrf.mxu0  ;;  %v146_v28 = vadd.f32 %v145_v24, %v91_v26 }
 0x174   :  { %v123_v29 = vadd.f32 %v122_v25, %v91_v26  ;;  %v257_v25 = vld [vmem:[%s916_s7] sm:$0xff]  ;;  %v258_v26 = vld [vmem:[%s916_s7 + $0x8] sm:$0xff] }
 0x175   :  { %v156_v35 = vmul.f32 0.2, %v146_v28  ;;  %vm152_vm8 = vcmp.gt.f32.partialorder %v146_v28, 0.0 }
 0x176   :  { %v155_v37 = vmul.f32 0.2, %v123_v29  ;;  %vm151_vm9 = vcmp.gt.f32.partialorder %v123_v29, 0.0 }
 0x177   :  { %v160_v41 = vsel %vm152_vm8, %v146_v28, %v156_v35  ;;  %vm550_vm8 = vcmask 261120  }
 0x178   :  { %v159_v42 = vsel %vm151_vm9, %v123_v29, %v155_v37 }
 0x17a   :  { %v148_v30 = vpop.f32.mrf.mxu1 }
 0x17b   :  { %v149_v31 = vadd.f32 %v148_v30, %v96_v27  ;;  %v125_v32 = vpop.f32.mrf.mxu0 }
 0x17c   :  { %v126_v33 = vadd.f32 %v125_v32, %v96_v27 }
 0x17d   :  { %vm154_vm6 = vcmp.gt.f32.partialorder %v149_v31, 0.0  ;;  %v158_v34 = vmul.f32 0.2, %v149_v31 }
 0x17e   :  { %vm153_vm7 = vcmp.gt.f32.partialorder %v126_v33, 0.0  ;;  %v157_v36 = vmul.f32 0.2, %v126_v33 }
 0x17f   :  { %v162_v38 = vsel %vm154_vm6, %v149_v31, %v158_v34 }
 0x180   :  { %208 = vmatpush.msra.mxu3 %v162_v38  ;;  %v161_v39 = vsel %vm153_vm7, %v126_v33, %v157_v36  ;;  %v319_v36 = vld [vmem:[%s918_s9] sm:$0xff] }
 0x181   :  { %188 = vmatpush.msra.mxu2 %v161_v39 }
 0x182   :  { %209 = vmatpush.msra.mxu3 %v160_v41  ;;  %v356_v41 = vld [vmem:[%s921_s12] sm:$0xff] }
 0x183   :  { %189 = vmatpush.msra.mxu2 %v159_v42  ;;  %596 = vmatmul.msk.f32.vlgmr.msra.gmra.mxu3 %vm170_vm10, %v163_v40  ;;  %v441_v42 = vld [vmem:[%s923_s14 + $0x10] sm:$0xff] }
 0x184   :  { %595 = vmatmul.msk.f32.vlgmr.msra.gmra.mxu2 %vm170_vm10, %v163_v40 }
 0x206   :  { %v211_v46 = vpop.f32.mrf.mxu3 }
 0x207   :  { %v212_v47 = vadd.f32 %v211_v46, %v168_v45  ;;  %v191_v48 = vpop.f32.mrf.mxu2 }
 0x208   :  { %v192_v49 = vadd.f32 %v191_v48, %v168_v45 }
 0x209   :  { %218 = vrot.lane.b32.xlu1 %v212_v47, %s694_s19  ;;  %v440_v47 = vld [vmem:[%s923_s14 + $0x8] sm:$0xff] }
 0x20a   :  { %216 = vrot.lane.b32.xlu0 %v192_v49, %s694_s19 }
 0x212   :  { %232 = vrot.lane.b32.xlu0 %v229_v50, %s694_s19 }
 0x27b   :  { %v219_v52 = vpop.permute.xlu1 %218 }
 0x27c   :  { %v217_v51 = vpop.permute.xlu0 %216 }
 0x27d   :  { %v224_v53 = vadd.f32 %v217_v51, %v784_v3  ;;  %v221_v55 = vsel %vm220_vm11, %v217_v51, %v219_v52  ;;  %v355_v51 = vld [vmem:[%s920_s11] sm:$0xff] }
 0x27e   :  { %v225_v57 = vadd.f32 %v221_v55, %v786_v4  ;;  %v396_v55 = vld [vmem:[%s922_s13 + $0x10] sm:$0xff] }
 0x27f   :  { %v826_v56 = vmul.f32 %v231_v54, %v224_v53  ;;  %v394_v53 = vld [vmem:[%s922_s13] sm:$0xff] }
 0x281   :  { %v241_v61 = vmul.f32 0.2, %v826_v56  ;;  %vm239_vm12 = vcmp.gt.f32.partialorder %v826_v56, 0.0 }
 0x283   :  { %v243_v63 = vsel %vm239_vm12, %v826_v56, %v241_v61 }
 0x284   :  { %v233_v58 = vpop.permute.xlu0 %232 }
 0x285   :  { %v234_v59 = vsel %vm220_vm11, %v231_v54, %v233_v58  ;;  %v395_v54 = vld [vmem:[%s922_s13 + $0x8] sm:$0xff] }
 0x286   :  { %v829_v60 = vmul.f32 %v234_v59, %v225_v57 }
 0x288   :  { %vm240_vm13 = vcmp.gt.f32.partialorder %v829_v60, 0.0  ;;  %v242_v62 = vmul.f32 0.2, %v829_v60 }
 0x28a   :  { %v244_v0 = vsel %vm240_vm13, %v829_v60, %v242_v62 }
 0x28b   :  { %v643_v1 = vpack.i.bf16 %v244_v0, %v243_v63 }
 0x28d   :  { %644 = vrot.lane.b32.xlu2 %v643_v1, %s691_s0  ;;  %639 = vrot.lane.b32.xlu1 %v643_v1, %s692_s1 }
 0x295   :  { %268 = vperm.xlu2 %637, %v260_v2  }
 0x2e7   :  { %v645_v3 = vpop.permute.xlu2 %644 }
 0x2e8   :  { %v647_v4 = vunpack.i.h.bf16 %v645_v3  ;;  %v646_v5 = vunpack.i.l.bf16 %v645_v3 }
 0x2ea   :  { %v251_v6 = vsel %vm72_vm4, %v646_v5, %v647_v4 }
 0x2eb   :  { %v653_v7 = vpack.i.bf16 %v647_v4, %v251_v6 }
 0x2ed   :  { %654 = vrot.lane.b32.xlu1 %v653_v7, %s691_s0 }
 0x2ef   :  { %v269_v27 = vpop.permute.xlu2 %268 }
 0x2f5   :  { %323 = vperm.xlu1 %636, %v320_v8  }
 0x2ff   :  { %v640_v9 = vpop.permute.xlu1 %639 }
 0x300   :  { %v642_v10 = vunpack.i.h.bf16 %v640_v9  ;;  %v641_v11 = vunpack.i.l.bf16 %v640_v9 }
 0x302   :  { %v256_v12 = vsel %vm80_vm3, %v641_v11, %v642_v10 }
 0x303   :  { %v648_v13 = vpack.i.bf16 %v642_v10, %v256_v12 }
 0x305   :  { %649 = vrot.lane.b32.xlu0 %v648_v13, %s691_s0 }
 0x30d   :  { %263 = vperm.xlu0 %658, %v259_v14   ;;  %v480_v14 = vlaneseq }
 0x315   :  { %449 = vperm.xlu0 %658, %v439_v15  }
 0x31d   :  { %464 = vperm.xlu0 %658, %v442_v16  }
 0x35f   :  { %v655_v17 = vpop.permute.xlu1 %654 }
 0x360   :  { %v657_v19 = vunpack.i.h.bf16 %v655_v17  ;;  %v656_v20 = vunpack.i.l.bf16 %v655_v17  ;;  %v481_v17 = vshrl.u32 %v480_v14, 7 }
 0x362   :  { %v279_v24 = vsel %vm72_vm4, %v656_v20, %v657_v19  ;;  %v482_v20 = vadd.s32 8, %v481_v17 }
 0x367   :  { %v324_v38 = vpop.permute.xlu1 %323 }
 0x377   :  { %v650_v18 = vpop.permute.xlu0 %649 }
 0x378   :  { %v652_v21 = vunpack.i.h.bf16 %v650_v18  ;;  %v651_v22 = vunpack.i.l.bf16 %v650_v18 }
 0x37a   :  { %v280_v23 = vsel %vm72_vm4, %v651_v22, %v652_v21  ;;  %v483_v21 = vadd.s32 16, %v481_v17  ;;  %v484_v22 = vadd.s32 24, %v481_v17 }
 0x37b   :  { %303 = vmatpush.msrb.mxu2 %v280_v23  ;;  %614 = vmatpush.msrb.mxu3 %v280_v23 }
 0x37d   :  { %304 = vmatpush.msrb.mxu2 %v279_v24  ;;  %615 = vmatpush.msrb.mxu3 %v279_v24 }
 0x37f   :  { %305 = vmatpush.msrb.mxu2 %v251_v6  ;;  %616 = vmatpush.msrb.mxu3 %v251_v6  ;;  %v264_v28 = vpop.permute.xlu0 %263 }
 0x380   :  { %597 = vmatmul.msk.f32.vlgmr.msrb.gmra.mxu2 %vm98_vm5, %v257_v25  ;;  %598 = vmatmul.msk.f32.vlgmr.msrb.gmra.mxu3 %vm98_vm5, %v258_v26  ;;  %v485_v25 = vcvt.s32.f32 %v481_v17  ;;  %v486_v26 = vcvt.s32.f32 %v482_v20 }
 0x387   :  { %v450_v61 = vpop.permute.xlu0 %449 }
 0x38f   :  { %v465_v7 = vpop.permute.xlu0 %464 }
 0x403   :  { %v307_v29 = vpop.f32.mrf.mxu2  ;;  %v310_v30 = vpop.f32.mrf.mxu3 }
 0x404   :  { %v308_v31 = vadd.f32 %v307_v29, %v264_v28  ;;  %v311_v32 = vadd.f32 %v310_v30, %v269_v27  ;;  %v487_v27 = vcvt.s32.f32 %v483_v21  ;;  %v488_v28 = vcvt.s32.f32 %v484_v22 }
 0x406   :  { %v315_v33 = vmul.f32 0.2, %v308_v31  ;;  %vm314_vm14 = vcmp.gt.f32.partialorder %v311_v32, 0.0  ;;  %v316_v34 = vmul.f32 0.2, %v311_v32  ;;  %vm313_vm15 = vcmp.gt.f32.partialorder %v308_v31, 0.0 }
 0x408   :  { %v318_v35 = vsel %vm314_vm14, %v311_v32, %v316_v34  ;;  %v317_v37 = vsel %vm313_vm15, %v308_v31, %v315_v33 }
 0x409   :  { %343 = vmatpush.msra.mxu3 %v318_v35 }
 0x40b   :  { %344 = vmatpush.msra.mxu3 %v317_v37 }
 0x40c   :  { %599 = vmatmul.msk.f32.vlgmr.msra.gmra.mxu3 %vm170_vm10, %v319_v36 }
 0x48f   :  { %v346_v39 = vpop.f32.mrf.mxu3 }
 0x490   :  { %v347_v40 = vadd.f32 %v346_v39, %v324_v38 }
 0x492   :  { %350 = vrot.lane.b32.xlu2 %v347_v40, %s690_s20 }
 0x49a   :  { %359 = vperm.xlu2 %637, %v356_v41  }
 0x4a2   :  { %459 = vperm.xlu2 %637, %v441_v42  }
 0x4ec   :  { %v351_v43 = vpop.permute.xlu2 %350 }
 0x4ed   :  { %v353_v44 = vadd.f32 %v351_v43, %v826_v56  ;;  %v354_v45 = vadd.f32 %v351_v43, %v829_v60  ;;  %v397_v56 = vld [vmem:[%s922_s13 + $0x18] sm:$0xff]  ;;  %v695_v43 = vmov 1.0   ;;  %s696_s13 = smov [#allocation2]  }
 0x4ee   :  { %s580_s22 = sshll.u32 %s696_s13, 4  ;;  %s581_s22 = int_to_ptr.vmem [resolvable:$true] %s580_s22 }
 0x4ef   :  { %v659_v46 = vpack.i.bf16 %v354_v45, %v353_v44 }
 0x4f1   :  { %660 = vrot.lane.b32.xlu1 %v659_v46, %s692_s1 }
 0x4f4   :  { %v360_v57 = vpop.permute.xlu2 %359 }
 0x4f9   :  { %454 = vperm.xlu1 %636, %v440_v47  }
 0x4fc   :  { %v460_v8 = vpop.permute.xlu2 %459 }
 0x52e   :  { %518 = vxpose.xlu1.b32.start [1/4] (short) (narrow) %v394_v53, 8 }
 0x536   :  { %519 = vxpose.xlu1.b32.cont [2/4] (short) (narrow) %v395_v54, 8 }
 0x53e   :  { %520 = vxpose.xlu1.b32.cont [3/4] (short) (narrow) %v396_v55, 8 }
 0x546   :  { %521 = vxpose.xlu1.b32.end [4/4] (short) (narrow) %v397_v56, 8 }
 0x563   :  { %v661_v48 = vpop.permute.xlu1 %660 }
 0x564   :  { %v663_v49 = vunpack.i.h.bf16 %v661_v48  ;;  %v662_v50 = vunpack.i.l.bf16 %v661_v48 }
 0x566   :  { %v368_v52 = vsel %vm80_vm3, %v662_v50, %v663_v49 }
 0x567   :  { %389 = vmatpush.msrb.mxu3 %v368_v52 }
 0x568   :  { %600 = vmatmul.msk.f32.vlgmr.msrb.gmra.mxu3 %vm370_vm0, %v355_v51 }
 0x56b   :  { %v455_v3 = vpop.permute.xlu1 %454 }
 0x5d2   :  { %v534_v44 = vpop.trf.xlu1 }
 0x5eb   :  { %v391_v58 = vpop.f32.mrf.mxu3 }
 0x5ec   :  { %v392_v59 = vadd.f32 %v391_v58, %v360_v57 }
 0x5ee   :  { %425 = vmatpush.msrb.mxu0 %v392_v59  ;;  %617 = vmatpush.msra.mxu2 %v392_v59 }
 0x5ef   :  { %601 = vmatmul.msk.f32.vlgmr.msrb.gmra.mxu0 %vm370_vm0, %v394_v53  ;;  %603 = vmatmul.msk.f32.vlgmr.msra.gmra.mxu2 %vm370_vm0, %v396_v55 }
 0x5f7   :  { %602 = vmatmul.msk.f32.gmra.mxu0 %vm370_vm0, %v395_v54  ;;  %604 = vmatmul.msk.f32.gmra.mxu2 %vm370_vm0, %v397_v56 }
 0x66c   :  { %v427_v60 = vpop.f32.mrf.mxu0 }
 0x66d   :  { %v443_v1 = vmul.f32 2.0, %v427_v60 }
 0x66f   :  { %v467_v9 = vsub.f32 %v450_v61, %v443_v1 }
 0x672   :  { %v433_v62 = vpop.f32.mrf.mxu2 }
 0x673   :  { %v445_v2 = vmul.f32 2.0, %v433_v62 }
 0x674   :  { %v430_v63 = vpop.f32.mrf.mxu0 }
 0x675   :  { %v444_v0 = vmul.f32 2.0, %v430_v63  ;;  %v469_v10 = vsub.f32 %v460_v8, %v445_v2 }
 0x677   :  { %v468_v5 = vsub.f32 %v455_v3, %v444_v0 }
 0x679   :  { %v471_v12 = vmin.f32 %v467_v9, %v468_v5 }
 0x67a   :  { %v436_v4 = vpop.f32.mrf.mxu2 }
 0x67b   :  { %v446_v6 = vmul.f32 2.0, %v436_v4 }
 0x67d   :  { %v470_v11 = vsub.f32 %v465_v7, %v446_v6 }
 0x67f   :  { %v472_v13 = vmin.f32 %v469_v10, %v470_v11 }
 0x681   :  { %v473_v15 = vmin.f32 %v471_v12, %v472_v13 }
 0x683   :  { %v474_v16 = vrot.slane %v473_v15, 4 }
 0x685   :  { %v475_v18 = vmin.f32 %v473_v15, %v474_v16 }
 0x687   :  { %v476_v19 = vrot.slane %v475_v18, 2 }
 0x689   :  { %v477_v23 = vmin.f32 %v475_v18, %v476_v19 }
 0x68b   :  { %v478_v24 = vrot.slane %v477_v23, 1 }
 0x68d   :  { %v479_v29 = vmin.f32 %v477_v23, %v478_v24 }
 0x68f   :  { %vm492_vm1 = vcmp.le.f32.partialorder %v470_v11, %v479_v29  ;;  %vm489_vm2 = vcmp.le.f32.partialorder %v467_v9, %v479_v29  ;;  %vm490_vm3 = vcmp.le.f32.partialorder %v468_v5, %v479_v29  ;;  %vm491_vm4 = vcmp.le.f32.partialorder %v469_v10, %v479_v29 }
 0x690   :  { %v493_v30 = vsel %vm489_vm2, %v485_v25, 32.0  ;;  %v494_v31 = vsel %vm490_vm3, %v486_v26, 32.0  ;;  %v495_v32 = vsel %vm491_vm4, %v487_v27, 32.0  ;;  %v496_v33 = vsel %vm492_vm1, %v488_v28, 32.0 }
 0x691   :  { %v497_v34 = vmin.f32 %v493_v30, %v494_v31  ;;  %v498_v35 = vmin.f32 %v495_v32, %v496_v33 }
 0x693   :  { %v499_v36 = vmin.f32 %v497_v34, %v498_v35 }
 0x695   :  { %v500_v37 = vrot.slane %v499_v36, 4 }
 0x697   :  { %v501_v38 = vmin.f32 %v499_v36, %v500_v37 }
 0x699   :  { %v502_v39 = vrot.slane %v501_v38, 2 }
 0x69b   :  { %v503_v40 = vmin.f32 %v501_v38, %v502_v39 }
 0x69d   :  { %v504_v41 = vrot.slane %v503_v40, 1 }
 0x69f   :  { %v505_v42 = vmin.f32 %v503_v40, %v504_v41 }
 0x6a1   :  { %vm509_vm5 = vcmp.eq.f32.partialorder %v488_v28, %v505_v42  ;;  %vm508_vm6 = vcmp.eq.f32.partialorder %v487_v27, %v505_v42  ;;  %vm507_vm7 = vcmp.eq.f32.partialorder %v486_v26, %v505_v42  ;;  %vm506_vm9 = vcmp.eq.f32.partialorder %v485_v25, %v505_v42 }
 0x6a2   :  { %609 = vmatpush.msk.msrb.mxu1 %vm509_vm5, %v695_v43 }
 0x6a4   :  { %610 = vmatpush.msk.msrb.mxu1 %vm508_vm6, %v695_v43 }
 0x6a6   :  { %611 = vmatpush.msk.msrb.mxu1 %vm507_vm7, %v695_v43 }
 0x6a8   :  { %612 = vmatpush.msk.msrb.mxu1 %vm506_vm9, %v695_v43 }
 0x6a9   :  { %613 = vmatmul.msk.f32.vlgmr.msrb.gmra.mxu1 %vm550_vm8, %v534_v44 }
 0x726   :  { %v571_v45 = vpop.f32.mrf.mxu1 }
 0x727   :  { %574 = vst [vmem:[#allocation2] sm:$0xff] %v571_v45 }
 0x728   :  { %585 = dma.vmem_to_hbm [thread:$0]  %s581_s22, 128, %s583_s25, [#allocation3]  }
 0x729   :  { %688 = dma.done.wait [#allocation3], 128  }
 0x72a   :  { %689 = vsyncadd [#allocation3], 4294967168 }
 0x72b   :  { %590 = vsyncpa [#allocation3], 1 }

</bundles_post_ra>
